<compile_context>
chip_gen: v7x
topology: tpu7x:2x2x1
jax: 0.10.0
libtpu: 0.0.40
codegen_flags: <defaults>
</compile_context>

<pallas_src>
import math

import jax
import jax.numpy as jnp
from jax import lax
from jax.experimental import pallas as pl
from jax.experimental.pallas import tpu as pltpu


_PARAM_ORDER = ("wqk", "bqk", "p", "vecs", "w1", "bf1", "w2")


def _vmem_capacity_bytes():
    """Physical VMEM per TensorCore; conservative 64 MiB (v7x) if the query fails."""
    try:
        cap = getattr(pltpu.get_tpu_info(), "vmem_capacity_bytes", None)
        if cap:
            return int(cap)
    except Exception:
        pass
    return 64 * 2**20


def _pick_batch_tile(B, S, vmem_cap):
    """Smallest divisor of B giving >= target matmul rows, while keeping the batch grid
    axis at >= 2 steps so the "parallel" axis can spread over v7x's two TensorCores."""
    target_rows = 256 if vmem_cap >= 96 * 2**20 else 128
    bt = B
    for cand in range(1, B + 1):
        if B % cand == 0 and cand * S >= target_rows:
            bt = cand
            break
    while bt > 1 and B // bt < 2:
        bt -= 1
        while bt > 1 and B % bt:
            bt -= 1
    return max(bt, 1)


def _pick_ffn_chunk(ffn_width):
    """Largest multiple-of-128 divisor of 4*D that is <= 2048 (caps the live fp32 GELU
    activation); falls back to the full width for small models."""
    if ffn_width <= 2048:
        return ffn_width
    for c in range(2048, 127, -128):
        if ffn_width % c == 0:
            return c
    return ffn_width


def _vmem_limit_bytes(D, H, S, bt, ffn_chunk, cap):
    """Estimate of the per-step VMEM footprint (weights, I/O blocks, intermediates)."""
    N = bt * S
    f32, bf16 = 4, 2
    per_head_w = D * 2 * D * bf16 + 2 * D * f32 + D * D * bf16           # wqk + bqk + p
    const_w = 6 * D * f32 + D * 4 * D * bf16 + 4 * D * f32 + 4 * D * D * bf16
    io = 2 * bt * S * D * f32                                             # x + out blocks
    acc = N * D * f32                                                     # attn accumulator
    inter = (N * 2 * D * f32          # fused QK projection (fp32)
             + 3 * bt * S * S * f32   # s1/s2/a1/a2 score / softmax maps
             + N * D * f32            # ctx
             + N * ffn_chunk * f32    # FFN chunk activation
             + 3 * N * D * f32)       # residual / LayerNorm temporaries
    est = 2 * (per_head_w + io) + 2 * const_w + acc + inter + (16 << 20)
    return int(min(int(0.9 * cap), max(est, 32 << 20)))


def _make_kernel(d_model, n_heads, seq_len, batch_tile, ffn_chunk):
    D, H, S, BT = d_model, n_heads, seq_len, batch_tile
    N = BT * S
    half = D // 2
    FFN = 4 * D
    CH = ffn_chunk
    n_chunks = FFN // CH
    inv_sqrt2 = 1.0 / math.sqrt(2.0)
    eps = 1e-5

    def _softmax_rows(x):
        # Exact reciprocal here: the output a1 - lambda*a2 is a difference of two
        # near-equal distributions, which amplifies approx-reciprocal error.
        m = jnp.max(x, axis=-1, keepdims=True)
        e = jnp.exp(x - m)
        return e / jnp.sum(e, axis=-1, keepdims=True)

    def _layernorm(y, g, b):
        mu = jnp.mean(y, axis=-1, keepdims=True)
        var = jnp.mean((y - mu) ** 2, axis=-1, keepdims=True)
        return (y - mu) * lax.rsqrt(var + eps) * g + b

    def kernel(lam_ref, x_ref, wqk_ref, bqk_ref, p_ref, vecs_ref,
               w1_ref, bf1_ref, w2_ref, out_ref, acc_ref):
        h = pl.program_id(1)                               # head grid axis (reduction)

        @pl.when(h == 0)
        def _init():
            acc_ref[...] = jnp.zeros_like(acc_ref)

        xb = x_ref[...]                                    # (BT, S, D) f32
        x_bf = xb.astype(jnp.bfloat16)                     # single bf16 copy, reused below
        x2_bf = x_bf.reshape(N, D)

        # Fused Q1|Q2|K1|K2 projection: one (N, D) @ (D, 2D) MXU pass for this head.
        # 1/sqrt(head_dim) and the Q biases are folded into wqk/bqk host-side; K biases
        # are dropped (softmax is invariant to per-query-row constants).
        y = jnp.dot(x2_bf, wqk_ref[...], preferred_element_type=jnp.float32)
        y = (y + bqk_ref[...]).astype(jnp.bfloat16).reshape(BT, S, 2 * D)
        q1 = y[..., 0:half]
        q2 = y[..., half:D]
        k1 = y[..., D:D + half]
        k2 = y[..., D + half:2 * D]

        s1 = jnp.einsum('bqd,bkd->bqk', q1, k1, preferred_element_type=jnp.float32)
        s2 = jnp.einsum('bqd,bkd->bqk', q2, k2, preferred_element_type=jnp.float32)
        # TODO(synk): flash-style KV tiling of the (S, S) differential softmax for long S.
        a1 = _softmax_rows(s1)
        a2 = _softmax_rows(s2)

        lam = lam_ref[h]                                   # scalar from SMEM
        diff = (a1 - lam * a2).astype(jnp.bfloat16)        # (BT, S, S)

        ctx = jnp.einsum('bqk,bkd->bqd', diff, x_bf,
                         preferred_element_type=jnp.float32)        # (BT, S, D)
        acc_ref[...] += jnp.dot(ctx.reshape(N, D).astype(jnp.bfloat16), p_ref[...],
                                preferred_element_type=jnp.float32)

        @pl.when(h == H - 1)
        def _finalize():
            x2 = xb.reshape(N, D)
            attn = acc_ref[...] + vecs_ref[0:1, :]         # folded value/out-proj bias c

            # ---- residual + LayerNorm 1 ----
            n1 = _layernorm(x2 + attn, vecs_ref[1:2, :], vecs_ref[2:3, :])
            n1_bf = n1.astype(jnp.bfloat16)

            # ---- FFN (Linear -> exact GELU -> Linear), hidden dim chunked ----
            f = jnp.zeros((N, D), jnp.float32)
            for ci in range(n_chunks):                     # static chunk loop
                lo = ci * CH
                a = jnp.dot(n1_bf, w1_ref[:, lo:lo + CH],
                            preferred_element_type=jnp.float32) + bf1_ref[:, lo:lo + CH]
                a = 0.5 * a * (1.0 + lax.erf(a * inv_sqrt2))   # exact GELU (PyTorch default)
                f = f + jnp.dot(a.astype(jnp.bfloat16), w2_ref[lo:lo + CH, :],
                                preferred_element_type=jnp.float32)
            f = f + vecs_ref[3:4, :]

            # ---- residual + LayerNorm 2 ----
            out = _layernorm(n1 + f, vecs_ref[4:5, :], vecs_ref[5:6, :])
            out_ref[...] = out.reshape(BT, S, D)

    return kernel


def fold_params(params, lam, n_heads):
    """Host-side algebraic folds (fp32):
       * P[h] = Wv_h @ Wout_h @ Wo_block_h and matching bias c (diff rows sum to 1-lam_h).
       * 1/sqrt(head_dim) and Q biases folded into the fused QK projection; K biases
         dropped (softmax per-row invariance).
       * Small (1, D) vectors packed into one (6, D) array.
    """
    H = n_heads
    D = params["wo"].shape[1]
    head_dim = D // H
    scale = 1.0 / math.sqrt(head_dim)

    wqkv = params["wqkv"]                       # (H, D, 2D), columns = Q1|Q2|K1|K2
    bqkv = params["bqkv"]                       # (H, 2D)

    wqk = jnp.concatenate([wqkv[:, :, :D] * scale, wqkv[:, :, D:]], axis=-1)
    bqk = jnp.concatenate([bqkv[:, :D] * scale, jnp.zeros_like(bqkv[:, :D])],
                          axis=-1)[:, None, :]                     # (H, 1, 2D)

    # P[h] = wv[h] @ woh[h] @ wo[h*D:(h+1)*D, :]    -> (H, D, D)
    vw = jnp.einsum("hdf,hfe->hde", params["wv"], params["woh"])
    wo3 = params["wo"].reshape(H, D, D)
    p = jnp.einsum("hde,hef->hdf", vw, wo3)

    # folded bias: each diff row sums to (1 - lam[h]) because softmax rows sum to 1.
    bvw = jnp.einsum("hf,hfe->he", params["bv"], params["woh"])      # (H, D)
    head_bias = (1.0 - lam)[:, None] * bvw + params["boh"]           # (H, D)
    c = jnp.einsum("he,hef->f", head_bias, wo3) + params["bo"][0]    # (D,)

    vecs = jnp.stack([c, params["g1"][0], params["be1"][0], params["bf2"][0],
                      params["g2"][0], params["be2"][0]], axis=0).astype(jnp.float32)

    bf16 = jnp.bfloat16
    return dict(
        wqk=wqk.astype(bf16),
        bqk=bqk.astype(jnp.float32),
        p=p.astype(bf16),
        vecs=vecs,
        w1=params["w1"].astype(bf16),
        bf1=params["bf1"].astype(jnp.float32),
        w2=params["w2"].astype(bf16),
    )


def diff_transformer_layer(x, params, lam, n_heads):
    B, S, D = x.shape
    H = n_heads
    folded = fold_params(params, lam, H)
    ordered = [folded[k] for k in _PARAM_ORDER]

    cap = _vmem_capacity_bytes()
    bt = _pick_batch_tile(B, S, cap)
    ffn_chunk = _pick_ffn_chunk(4 * D)
    kernel = _make_kernel(D, H, S, bt, ffn_chunk)

    in_specs = [
        pl.BlockSpec(memory_space=pltpu.MemorySpace.SMEM),          # per-head lambdas
        pl.BlockSpec((bt, S, D), lambda b, h: (b, 0, 0)),           # x tile (bt batches)
        pl.BlockSpec((None, D, 2 * D), lambda b, h: (h, 0, 0)),     # fused QK weight, head h
        pl.BlockSpec((None, 1, 2 * D), lambda b, h: (h, 0, 0)),     # fused QK bias,   head h
        pl.BlockSpec((None, D, D), lambda b, h: (h, 0, 0)),         # folded value/out proj P[h]
        pl.BlockSpec((6, D), lambda b, h: (0, 0)),                  # packed c/g1/be1/bf2/g2/be2
        pl.BlockSpec((D, 4 * D), lambda b, h: (0, 0)),              # FFN w1
        pl.BlockSpec((1, 4 * D), lambda b, h: (0, 0)),              # FFN b1
        pl.BlockSpec((4 * D, D), lambda b, h: (0, 0)),              # FFN w2
    ]
    out_specs = pl.BlockSpec((bt, S, D), lambda b, h: (b, 0, 0))

    vmem_limit = _vmem_limit_bytes(D, H, S, bt, ffn_chunk, cap)

    return pl.pallas_call(
        kernel,
        out_shape=jax.ShapeDtypeStruct((B, S, D), jnp.float32),
        grid=(B // bt, H),                        # head (reduction) axis last
        in_specs=in_specs,
        out_specs=out_specs,
        scratch_shapes=[pltpu.VMEM((bt * S, D), jnp.float32)],   # per-head attn accumulator
        compiler_params=pltpu.CompilerParams(
            dimension_semantics=("parallel", "arbitrary"),
            vmem_limit_bytes=vmem_limit),
    )(lam.astype(jnp.float32), x, *ordered)


def make_params(key, d_model, n_heads, scale=0.1):
    H, hd = n_heads, d_model // n_heads
    keys = jax.random.split(key, 16)

    def rnd(k, shape):
        return scale * jax.random.normal(k, shape, dtype=jnp.float32)

    params = dict(
        # per-head DifferentialAttention weights, stacked along leading head axis
        wqkv=rnd(keys[0], (H, d_model, 2 * d_model)),
        bqkv=rnd(keys[1], (H, 2 * d_model)),
        wv=rnd(keys[2], (H, d_model, 2 * d_model * H)),
        bv=rnd(keys[3], (H, 2 * d_model * H)),
        woh=rnd(keys[4], (H, 2 * d_model * H, d_model)),
        boh=rnd(keys[5], (H, d_model)),
        lambda_q1=rnd(keys[6], (H, hd)),
        lambda_k1=rnd(keys[7], (H, hd)),
        lambda_q2=rnd(keys[8], (H, hd)),
        lambda_k2=rnd(keys[9], (H, hd)),
        # MultiHeadDifferentialAttention out_proj
        wo=rnd(keys[10], (d_model * H, d_model)),
        bo=rnd(keys[11], (1, d_model)),
        # LayerNorms (PyTorch default init: gamma=1, beta=0)
        g1=jnp.ones((1, d_model), jnp.float32),
        be1=jnp.zeros((1, d_model), jnp.float32),
        g2=jnp.ones((1, d_model), jnp.float32),
        be2=jnp.zeros((1, d_model), jnp.float32),
        # FFN
        w1=rnd(keys[12], (d_model, 4 * d_model)),
        bf1=rnd(keys[13], (1, 4 * d_model)),
        w2=rnd(keys[14], (4 * d_model, d_model)),
        bf2=rnd(keys[15], (1, d_model)),
    )
    return params


def compute_lambda(params, lambda_init=0.5, layer_index=0):
    # DifferentialAttention.get_lambda(): scalar per head.
    l1 = jnp.sum(params["lambda_q1"] * params["lambda_k1"], axis=-1)
    l2 = jnp.sum(params["lambda_q2"] * params["lambda_k2"], axis=-1)
    decay = lambda_init - 0.6 * jnp.exp(jnp.float32(-0.3 * layer_index))
    return (jnp.exp(l1) - jnp.exp(l2) + decay).astype(jnp.float32)   # (H,)


def reference(x, params, lam, n_heads):
    """Pure-JAX fp32 mirror of the PyTorch forward (eval mode), for validation."""
    D = x.shape[-1]
    hd = D // n_heads
    half = D // 2
    head_outs = []
    for h in range(n_heads):
        qkv = x @ params["wqkv"][h] + params["bqkv"][h]
        q1, q2 = qkv[..., :half], qkv[..., half:D]
        k1, k2 = qkv[..., D:D + half], qkv[..., D + half:]
        v = x @ params["wv"][h] + params["bv"][h]
        a1 = jax.nn.softmax(jnp.einsum("bsd,btd->bst", q1, k1) / math.sqrt(hd), axis=-1)
        a2 = jax.nn.softmax(jnp.einsum("bsd,btd->bst", q2, k2) / math.sqrt(hd), axis=-1)
        o = jnp.einsum("bst,btf->bsf", a1 - lam[h] * a2, v)
        head_outs.append(o @ params["woh"][h] + params["boh"][h])
    concat = jnp.concatenate(head_outs, axis=-1)
    attn_out = concat @ params["wo"] + params["bo"][0]

    def ln(y, g, b):
        mu = y.mean(-1, keepdims=True)
        var = ((y - mu) ** 2).mean(-1, keepdims=True)
        return (y - mu) / jnp.sqrt(var + 1e-5) * g + b

    h1 = ln(x + attn_out, params["g1"][0], params["be1"][0])
    a = h1 @ params["w1"] + params["bf1"][0]
    a = 0.5 * a * (1.0 + lax.erf(a / math.sqrt(2.0)))
    f = a @ params["w2"] + params["bf2"][0]
    return ln(h1 + f, params["g2"][0], params["be2"][0])


if __name__ == "__main__":
    B, S, D, H = 2, 8, 32, 4   # batch, seq, d_model, n_heads (head_dim = 8)
    key = jax.random.PRNGKey(0)
    kx, kp = jax.random.split(key)
    x = jax.random.normal(kx, (B, S, D), dtype=jnp.float32)
    params = make_params(kp, D, H)
    lam = compute_lambda(params, lambda_init=0.5, layer_index=0)

    out = diff_transformer_layer(x, params, lam, H)
    out = jax.block_until_ready(out)

    ref = reference(x, params, lam, H)
    assert out.shape == (B, S, D)
    # bf16 MXU inputs (fp32 accumulation) vs fp32 reference: expect bf16-level agreement.
    max_err = float(jnp.max(jnp.abs(out - ref)))
    assert max_err < 5e-2, f"max abs err {max_err}"
    print("KERNEL_OK")
</pallas_src>

<mosaic_0001>
module attributes {stable_mosaic.version = 11 : i64} {
  func.func @kernel(%arg0: i32, %arg1: i32, %arg2: memref<4xf32, #tpu.memory_space<smem>>, %arg3: memref<1x8x32xf32, #tpu.memory_space<vmem>>, %arg4: memref<1x32x64xbf16, #tpu.memory_space<vmem>>, %arg5: memref<1x1x64xf32, #tpu.memory_space<vmem>>, %arg6: memref<1x32x32xbf16, #tpu.memory_space<vmem>>, %arg7: memref<6x32xf32, #tpu.memory_space<vmem>>, %arg8: memref<32x128xbf16, #tpu.memory_space<vmem>>, %arg9: memref<1x128xf32, #tpu.memory_space<vmem>>, %arg10: memref<128x32xbf16, #tpu.memory_space<vmem>>, %arg11: memref<1x8x32xf32, #tpu.memory_space<vmem>>, %arg12: memref<8x32xf32, #tpu.memory_space<vmem>>) attributes {dimension_semantics = [#tpu.dimension_semantics<parallel>, #tpu.dimension_semantics<arbitrary>], iteration_bounds = array<i64: 2, 4>, scalar_prefetch = 0 : i64, scratch_operands = 1 : i64, tpu.core_type = #tpu.core_type<tc>, window_params = [{transform_indices = @transform_0, window_bounds = array<i64: 4>}, {transform_indices = @transform_1, window_bounds = array<i64: 1, 8, 32>}, {transform_indices = @transform_2, window_bounds = array<i64: 1, 32, 64>}, {transform_indices = @transform_3, window_bounds = array<i64: 1, 1, 64>}, {transform_indices = @transform_4, window_bounds = array<i64: 1, 32, 32>}, {pipeline_mode = #tpu.pipeline_mode<synchronous>, transform_indices = @transform_5, window_bounds = array<i64: 6, 32>}, {pipeline_mode = #tpu.pipeline_mode<synchronous>, transform_indices = @transform_6, window_bounds = array<i64: 32, 128>}, {pipeline_mode = #tpu.pipeline_mode<synchronous>, transform_indices = @transform_7, window_bounds = array<i64: 1, 128>}, {pipeline_mode = #tpu.pipeline_mode<synchronous>, transform_indices = @transform_8, window_bounds = array<i64: 128, 32>}, {transform_indices = @transform_9, window_bounds = array<i64: 1, 8, 32>}]} {
    %c0_i32 = arith.constant 0 : i32
    %0 = arith.cmpi eq, %arg1, %c0_i32 : i32
    %1 = arith.extui %0 : i1 to i32
    %c0_i32_0 = arith.constant 0 : i32
    %2 = arith.cmpi ne, %1, %c0_i32_0 : i32
    scf.if %2 {
      %cst_25 = arith.constant 0.000000e+00 : f32
      %57 = vector.broadcast %cst_25 : f32 to vector<8x32xf32>
      %c0_26 = arith.constant 0 : index
      %c0_27 = arith.constant 0 : index
      %58 = vector.load %arg12[%c0_26, %c0_27] : memref<8x32xf32, #tpu.memory_space<vmem>>, vector<8x32xf32>
      tpu.vector_store %arg12[%c0_26, %c0_27], %57 {strides = array<i32>} : memref<8x32xf32, #tpu.memory_space<vmem>>, vector<8x32xf32>,
    } else {
    }
    %c0 = arith.constant 0 : index
    %c0_1 = arith.constant 0 : index
    %c0_2 = arith.constant 0 : index
    %3 = vector.load %arg3[%c0, %c0_1, %c0_2] : memref<1x8x32xf32, #tpu.memory_space<vmem>>, vector<1x8x32xf32>
    %4 = arith.truncf %3 : vector<1x8x32xf32> to vector<1x8x32xbf16>
    %5 = vector.shape_cast %4 : vector<1x8x32xbf16> to vector<8x32xbf16>
    %c0_3 = arith.constant 0 : index
    %c0_4 = arith.constant 0 : index
    %c0_5 = arith.constant 0 : index
    %6 = vector.load %arg4[%c0_3, %c0_4, %c0_5] : memref<1x32x64xbf16, #tpu.memory_space<vmem>>, vector<1x32x64xbf16>
    %7 = vector.shape_cast %6 : vector<1x32x64xbf16> to vector<32x64xbf16>
    %cst = arith.constant dense<0.000000e+00> : vector<8x64xf32>
    %8 = tpu.matmul %5, %7, %cst {dimension_numbers = #tpu.dot_dimension_numbers<[1], [0], [0], [1], [0, 0, 1, 1], [], []>} : vector<8x32xbf16>, vector<32x64xbf16>, vector<8x64xf32> -> vector<8x64xf32>
    %c0_6 = arith.constant 0 : index
    %c0_7 = arith.constant 0 : index
    %c0_8 = arith.constant 0 : index
    %9 = vector.load %arg5[%c0_6, %c0_7, %c0_8] : memref<1x1x64xf32, #tpu.memory_space<vmem>>, vector<1x1x64xf32>
    %10 = vector.shape_cast %9 : vector<1x1x64xf32> to vector<1x64xf32>
    %11 = vector.broadcast %10 : vector<1x64xf32> to vector<8x64xf32>
    %12 = arith.addf %8, %11 : vector<8x64xf32>
    %13 = arith.truncf %12 : vector<8x64xf32> to vector<8x64xbf16>
    %14 = vector.shape_cast %13 : vector<8x64xbf16> to vector<1x8x64xbf16>
    %15 = vector.extract_strided_slice %14 {offsets = [0, 0, 0], sizes = [1, 8, 16], strides = [1, 1, 1]} : vector<1x8x64xbf16> to vector<1x8x16xbf16>
    %16 = vector.extract_strided_slice %14 {offsets = [0, 0, 16], sizes = [1, 8, 16], strides = [1, 1, 1]} : vector<1x8x64xbf16> to vector<1x8x16xbf16>
    %17 = vector.extract_strided_slice %14 {offsets = [0, 0, 32], sizes = [1, 8, 16], strides = [1, 1, 1]} : vector<1x8x64xbf16> to vector<1x8x16xbf16>
    %18 = vector.extract_strided_slice %14 {offsets = [0, 0, 48], sizes = [1, 8, 16], strides = [1, 1, 1]} : vector<1x8x64xbf16> to vector<1x8x16xbf16>
    "tpu.trace_start"() <{level = 10 : i32, message = "bqd,bkd->bqk"}> : () -> ()
    %cst_9 = arith.constant dense<0.000000e+00> : vector<1x8x8xf32>
    %19 = tpu.matmul %15, %17, %cst_9 {dimension_numbers = #tpu.dot_dimension_numbers<[2], [2], [1], [1], [0, 0, 0, 1, 1, 1], [0], [0]>} : vector<1x8x16xbf16>, vector<1x8x16xbf16>, vector<1x8x8xf32> -> vector<1x8x8xf32>
    %cst_10 = arith.constant dense<0.000000e+00> : vector<1x8x8xf32>
    %20 = tpu.matmul %16, %18, %cst_10 {dimension_numbers = #tpu.dot_dimension_numbers<[2], [2], [1], [1], [0, 0, 0, 1, 1, 1], [0], [0]>} : vector<1x8x16xbf16>, vector<1x8x16xbf16>, vector<1x8x8xf32> -> vector<1x8x8xf32>
    "tpu.trace_stop"() : () -> ()
    %cst_11 = arith.constant dense<0xFF800000> : vector<1x8xf32>
    %21 = vector.multi_reduction <maximumf>, %19, %cst_11 [2] : vector<1x8x8xf32> to vector<1x8xf32>
    %22 = vector.shape_cast %21 : vector<1x8xf32> to vector<1x8x1xf32>
    %23 = vector.broadcast %22 : vector<1x8x1xf32> to vector<1x8x8xf32>
    %24 = arith.subf %19, %23 : vector<1x8x8xf32>
    %25 = math.exp %24 : vector<1x8x8xf32>
    %cst_12 = arith.constant dense<0.000000e+00> : vector<1x8xf32>
    %26 = vector.multi_reduction <add>, %25, %cst_12 [2] : vector<1x8x8xf32> to vector<1x8xf32>
    %27 = vector.shape_cast %26 : vector<1x8xf32> to vector<1x8x1xf32>
    %28 = vector.broadcast %27 : vector<1x8x1xf32> to vector<1x8x8xf32>
    %29 = arith.divf %25, %28 : vector<1x8x8xf32>
    %cst_13 = arith.constant dense<0xFF800000> : vector<1x8xf32>
    %30 = vector.multi_reduction <maximumf>, %20, %cst_13 [2] : vector<1x8x8xf32> to vector<1x8xf32>
    %31 = vector.shape_cast %30 : vector<1x8xf32> to vector<1x8x1xf32>
    %32 = vector.broadcast %31 : vector<1x8x1xf32> to vector<1x8x8xf32>
    %33 = arith.subf %20, %32 : vector<1x8x8xf32>
    %34 = math.exp %33 : vector<1x8x8xf32>
    %cst_14 = arith.constant dense<0.000000e+00> : vector<1x8xf32>
    %35 = vector.multi_reduction <add>, %34, %cst_14 [2] : vector<1x8x8xf32> to vector<1x8xf32>
    %36 = vector.shape_cast %35 : vector<1x8xf32> to vector<1x8x1xf32>
    %37 = vector.broadcast %36 : vector<1x8x1xf32> to vector<1x8x8xf32>
    %38 = arith.divf %34, %37 : vector<1x8x8xf32>
    %39 = arith.index_cast %arg1 : i32 to index
    %40 = memref.load %arg2[%39] : memref<4xf32, #tpu.memory_space<smem>>
    %41 = vector.broadcast %40 : f32 to vector<1x8x8xf32>
    %42 = arith.mulf %41, %38 : vector<1x8x8xf32>
    %43 = arith.subf %29, %42 : vector<1x8x8xf32>
    %44 = arith.truncf %43 : vector<1x8x8xf32> to vector<1x8x8xbf16>
    "tpu.trace_start"() <{level = 10 : i32, message = "bqk,bkd->bqd"}> : () -> ()
    %cst_15 = arith.constant dense<0.000000e+00> : vector<1x8x32xf32>
    %45 = tpu.matmul %44, %4, %cst_15 {dimension_numbers = #tpu.dot_dimension_numbers<[2], [1], [1], [2], [0, 0, 0, 1, 1, 2], [0], [0]>} : vector<1x8x8xbf16>, vector<1x8x32xbf16>, vector<1x8x32xf32> -> vector<1x8x32xf32>
    "tpu.trace_stop"() : () -> ()
    %c0_16 = arith.constant 0 : index
    %c0_17 = arith.constant 0 : index
    %46 = vector.load %arg12[%c0_16, %c0_17] : memref<8x32xf32, #tpu.memory_space<vmem>>, vector<8x32xf32>
    %47 = vector.shape_cast %45 : vector<1x8x32xf32> to vector<8x32xf32>
    %48 = arith.truncf %47 : vector<8x32xf32> to vector<8x32xbf16>
    %c0_18 = arith.constant 0 : index
    %c0_19 = arith.constant 0 : index
    %c0_20 = arith.constant 0 : index
    %49 = vector.load %arg6[%c0_18, %c0_19, %c0_20] : memref<1x32x32xbf16, #tpu.memory_space<vmem>>, vector<1x32x32xbf16>
    %50 = vector.shape_cast %49 : vector<1x32x32xbf16> to vector<32x32xbf16>
    %cst_21 = arith.constant dense<0.000000e+00> : vector<8x32xf32>
    %51 = tpu.matmul %48, %50, %cst_21 {dimension_numbers = #tpu.dot_dimension_numbers<[1], [0], [0], [1], [0, 0, 1, 1], [], []>} : vector<8x32xbf16>, vector<32x32xbf16>, vector<8x32xf32> -> vector<8x32xf32>
    %52 = arith.addf %46, %51 : vector<8x32xf32>
    %c0_22 = arith.constant 0 : index
    %c0_23 = arith.constant 0 : index
    %53 = vector.load %arg12[%c0_22, %c0_23] : memref<8x32xf32, #tpu.memory_space<vmem>>, vector<8x32xf32>
    tpu.vector_store %arg12[%c0_22, %c0_23], %52 {strides = array<i32>} : memref<8x32xf32, #tpu.memory_space<vmem>>, vector<8x32xf32>,
    %c3_i32 = arith.constant 3 : i32
    %54 = arith.cmpi eq, %arg1, %c3_i32 : i32
    %55 = arith.extui %54 : i1 to i32
    %c0_i32_24 = arith.constant 0 : i32
    %56 = arith.cmpi ne, %55, %c0_i32_24 : i32
    scf.if %56 {
      %57 = vector.shape_cast %3 : vector<1x8x32xf32> to vector<8x32xf32>
      %c0_25 = arith.constant 0 : index
      %c0_26 = arith.constant 0 : index
      %58 = vector.load %arg12[%c0_25, %c0_26] : memref<8x32xf32, #tpu.memory_space<vmem>>, vector<8x32xf32>
      %c0_27 = arith.constant 0 : index
      %c0_28 = arith.constant 0 : index
      %59 = vector.load %arg7[%c0_27, %c0_28] : memref<6x32xf32, #tpu.memory_space<vmem>>, vector<1x32xf32>
      %60 = vector.broadcast %59 : vector<1x32xf32> to vector<8x32xf32>
      %61 = arith.addf %58, %60 : vector<8x32xf32>
      %62 = arith.addf %57, %61 : vector<8x32xf32>
      %c1 = arith.constant 1 : index
      %c0_29 = arith.constant 0 : index
      %63 = vector.load %arg7[%c1, %c0_29] : memref<6x32xf32, #tpu.memory_space<vmem>>, vector<1x32xf32>
      %c2 = arith.constant 2 : index
      %c0_30 = arith.constant 0 : index
      %64 = vector.load %arg7[%c2, %c0_30] : memref<6x32xf32, #tpu.memory_space<vmem>>, vector<1x32xf32>
      %cst_31 = arith.constant dense<0.000000e+00> : vector<8xf32>
      %65 = vector.multi_reduction <add>, %62, %cst_31 [1] : vector<8x32xf32> to vector<8xf32>
      %66 = vector.shape_cast %65 : vector<8xf32> to vector<8x1xf32>
      %cst_32 = arith.constant 3.200000e+01 : f32
      %67 = vector.broadcast %cst_32 : f32 to vector<8x1xf32>
      %68 = arith.divf %66, %67 : vector<8x1xf32>
      %69 = vector.broadcast %68 : vector<8x1xf32> to vector<8x32xf32>
      %70 = arith.subf %62, %69 : vector<8x32xf32>
      %71 = arith.mulf %70, %70 : vector<8x32xf32>
      %cst_33 = arith.constant dense<0.000000e+00> : vector<8xf32>
      %72 = vector.multi_reduction <add>, %71, %cst_33 [1] : vector<8x32xf32> to vector<8xf32>
      %73 = vector.shape_cast %72 : vector<8xf32> to vector<8x1xf32>
      %cst_34 = arith.constant 3.200000e+01 : f32
      %74 = vector.broadcast %cst_34 : f32 to vector<8x1xf32>
      %75 = arith.divf %73, %74 : vector<8x1xf32>
      %76 = vector.broadcast %68 : vector<8x1xf32> to vector<8x32xf32>
      %77 = arith.subf %62, %76 : vector<8x32xf32>
      %cst_35 = arith.constant 9.99999974E-6 : f32
      %78 = vector.broadcast %cst_35 : f32 to vector<8x1xf32>
      %79 = arith.addf %75, %78 : vector<8x1xf32>
      %80 = math.rsqrt %79 : vector<8x1xf32>
      %81 = vector.broadcast %80 : vector<8x1xf32> to vector<8x32xf32>
      %82 = arith.mulf %77, %81 : vector<8x32xf32>
      %83 = vector.broadcast %63 : vector<1x32xf32> to vector<8x32xf32>
      %84 = arith.mulf %82, %83 : vector<8x32xf32>
      %85 = vector.broadcast %64 : vector<1x32xf32> to vector<8x32xf32>
      %86 = arith.addf %84, %85 : vector<8x32xf32>
      %87 = arith.truncf %86 : vector<8x32xf32> to vector<8x32xbf16>
      %cst_36 = arith.constant 0.000000e+00 : f32
      %88 = vector.broadcast %cst_36 : f32 to vector<8x32xf32>
      %c0_37 = arith.constant 0 : index
      %c0_38 = arith.constant 0 : index
      %89 = vector.load %arg8[%c0_37, %c0_38] : memref<32x128xbf16, #tpu.memory_space<vmem>>, vector<32x128xbf16>
      %cst_39 = arith.constant dense<0.000000e+00> : vector<8x128xf32>
      %90 = tpu.matmul %87, %89, %cst_39 {dimension_numbers = #tpu.dot_dimension_numbers<[1], [0], [0], [1], [0, 0, 1, 1], [], []>} : vector<8x32xbf16>, vector<32x128xbf16>, vector<8x128xf32> -> vector<8x128xf32>
      %c0_40 = arith.constant 0 : index
      %c0_41 = arith.constant 0 : index
      %91 = vector.load %arg9[%c0_40, %c0_41] : memref<1x128xf32, #tpu.memory_space<vmem>>, vector<1x128xf32>
      %92 = vector.broadcast %91 : vector<1x128xf32> to vector<8x128xf32>
      %93 = arith.addf %90, %92 : vector<8x128xf32>
      %cst_42 = arith.constant 5.000000e-01 : f32
      %94 = vector.broadcast %cst_42 : f32 to vector<8x128xf32>
      %95 = arith.mulf %94, %93 : vector<8x128xf32>
      %cst_43 = arith.constant 0.707106769 : f32
      %96 = vector.broadcast %cst_43 : f32 to vector<8x128xf32>
      %97 = arith.mulf %93, %96 : vector<8x128xf32>
      %98 = math.erf %97 : vector<8x128xf32>
      %cst_44 = arith.constant 1.000000e+00 : f32
      %99 = vector.broadcast %cst_44 : f32 to vector<8x128xf32>
      %100 = arith.addf %99, %98 : vector<8x128xf32>
      %101 = arith.mulf %95, %100 : vector<8x128xf32>
      %102 = arith.truncf %101 : vector<8x128xf32> to vector<8x128xbf16>
      %c0_45 = arith.constant 0 : index
      %c0_46 = arith.constant 0 : index
      %103 = vector.load %arg10[%c0_45, %c0_46] : memref<128x32xbf16, #tpu.memory_space<vmem>>, vector<128x32xbf16>
      %cst_47 = arith.constant dense<0.000000e+00> : vector<8x32xf32>
      %104 = tpu.matmul %102, %103, %cst_47 {dimension_numbers = #tpu.dot_dimension_numbers<[1], [0], [0], [1], [0, 0, 1, 1], [], []>} : vector<8x128xbf16>, vector<128x32xbf16>, vector<8x32xf32> -> vector<8x32xf32>
      %105 = arith.addf %88, %104 : vector<8x32xf32>
      %c3 = arith.constant 3 : index
      %c0_48 = arith.constant 0 : index
      %106 = vector.load %arg7[%c3, %c0_48] : memref<6x32xf32, #tpu.memory_space<vmem>>, vector<1x32xf32>
      %107 = vector.broadcast %106 : vector<1x32xf32> to vector<8x32xf32>
      %108 = arith.addf %105, %107 : vector<8x32xf32>
      %109 = arith.addf %86, %108 : vector<8x32xf32>
      %c4 = arith.constant 4 : index
      %c0_49 = arith.constant 0 : index
      %110 = vector.load %arg7[%c4, %c0_49] : memref<6x32xf32, #tpu.memory_space<vmem>>, vector<1x32xf32>
      %c5 = arith.constant 5 : index
      %c0_50 = arith.constant 0 : index
      %111 = vector.load %arg7[%c5, %c0_50] : memref<6x32xf32, #tpu.memory_space<vmem>>, vector<1x32xf32>
      %cst_51 = arith.constant dense<0.000000e+00> : vector<8xf32>
      %112 = vector.multi_reduction <add>, %109, %cst_51 [1] : vector<8x32xf32> to vector<8xf32>
      %113 = vector.shape_cast %112 : vector<8xf32> to vector<8x1xf32>
      %cst_52 = arith.constant 3.200000e+01 : f32
      %114 = vector.broadcast %cst_52 : f32 to vector<8x1xf32>
      %115 = arith.divf %113, %114 : vector<8x1xf32>
      %116 = vector.broadcast %115 : vector<8x1xf32> to vector<8x32xf32>
      %117 = arith.subf %109, %116 : vector<8x32xf32>
      %118 = arith.mulf %117, %117 : vector<8x32xf32>
      %cst_53 = arith.constant dense<0.000000e+00> : vector<8xf32>
      %119 = vector.multi_reduction <add>, %118, %cst_53 [1] : vector<8x32xf32> to vector<8xf32>
      %120 = vector.shape_cast %119 : vector<8xf32> to vector<8x1xf32>
      %cst_54 = arith.constant 3.200000e+01 : f32
      %121 = vector.broadcast %cst_54 : f32 to vector<8x1xf32>
      %122 = arith.divf %120, %121 : vector<8x1xf32>
      %123 = vector.broadcast %115 : vector<8x1xf32> to vector<8x32xf32>
      %124 = arith.subf %109, %123 : vector<8x32xf32>
      %cst_55 = arith.constant 9.99999974E-6 : f32
      %125 = vector.broadcast %cst_55 : f32 to vector<8x1xf32>
      %126 = arith.addf %122, %125 : vector<8x1xf32>
      %127 = math.rsqrt %126 : vector<8x1xf32>
      %128 = vector.broadcast %127 : vector<8x1xf32> to vector<8x32xf32>
      %129 = arith.mulf %124, %128 : vector<8x32xf32>
      %130 = vector.broadcast %110 : vector<1x32xf32> to vector<8x32xf32>
      %131 = arith.mulf %129, %130 : vector<8x32xf32>
      %132 = vector.broadcast %111 : vector<1x32xf32> to vector<8x32xf32>
      %133 = arith.addf %131, %132 : vector<8x32xf32>
      %134 = vector.shape_cast %133 : vector<8x32xf32> to vector<1x8x32xf32>
      %c0_56 = arith.constant 0 : index
      %c0_57 = arith.constant 0 : index
      %c0_58 = arith.constant 0 : index
      %135 = vector.load %arg11[%c0_56, %c0_57, %c0_58] : memref<1x8x32xf32, #tpu.memory_space<vmem>>, vector<1x8x32xf32>
      tpu.vector_store %arg11[%c0_56, %c0_57, %c0_58], %134 {strides = array<i32>} : memref<1x8x32xf32, #tpu.memory_space<vmem>>, vector<1x8x32xf32>,
    } else {
    }
    return
  }
  func.func @transform_0(%arg0: i32, %arg1: i32) -> i32 {
    %c0_i32 = arith.constant 0 : i32
    %c0_i32_0 = arith.constant 0 : i32
    return %c0_i32 : i32
  }
  func.func @transform_1(%arg0: i32, %arg1: i32) -> (i32, i32, i32) {
    %c0_i32 = arith.constant 0 : i32
    %c0_i32_0 = arith.constant 0 : i32
    %c0_i32_1 = arith.constant 0 : i32
    return %arg0, %c0_i32, %c0_i32_0 : i32, i32, i32
  }
  func.func @transform_2(%arg0: i32, %arg1: i32) -> (i32, i32, i32) {
    %c0_i32 = arith.constant 0 : i32
    %c0_i32_0 = arith.constant 0 : i32
    %c0_i32_1 = arith.constant 0 : i32
    return %arg1, %c0_i32, %c0_i32_0 : i32, i32, i32
  }
  func.func @transform_3(%arg0: i32, %arg1: i32) -> (i32, i32, i32) {
    %c0_i32 = arith.constant 0 : i32
    %c0_i32_0 = arith.constant 0 : i32
    %c0_i32_1 = arith.constant 0 : i32
    return %arg1, %c0_i32, %c0_i32_0 : i32, i32, i32
  }
  func.func @transform_4(%arg0: i32, %arg1: i32) -> (i32, i32, i32) {
    %c0_i32 = arith.constant 0 : i32
    %c0_i32_0 = arith.constant 0 : i32
    %c0_i32_1 = arith.constant 0 : i32
    return %arg1, %c0_i32, %c0_i32_0 : i32, i32, i32
  }
  func.func @transform_5(%arg0: i32, %arg1: i32) -> (i32, i32) {
    %c0_i32 = arith.constant 0 : i32
    %c0_i32_0 = arith.constant 0 : i32
    %c0_i32_1 = arith.constant 0 : i32
    return %c0_i32, %c0_i32_0 : i32, i32
  }
  func.func @transform_6(%arg0: i32, %arg1: i32) -> (i32, i32) {
    %c0_i32 = arith.constant 0 : i32
    %c0_i32_0 = arith.constant 0 : i32
    %c0_i32_1 = arith.constant 0 : i32
    return %c0_i32, %c0_i32_0 : i32, i32
  }
  func.func @transform_7(%arg0: i32, %arg1: i32) -> (i32, i32) {
    %c0_i32 = arith.constant 0 : i32
    %c0_i32_0 = arith.constant 0 : i32
    %c0_i32_1 = arith.constant 0 : i32
    return %c0_i32, %c0_i32_0 : i32, i32
  }
  func.func @transform_8(%arg0: i32, %arg1: i32) -> (i32, i32) {
    %c0_i32 = arith.constant 0 : i32
    %c0_i32_0 = arith.constant 0 : i32
    %c0_i32_1 = arith.constant 0 : i32
    return %c0_i32, %c0_i32_0 : i32, i32
  }
  func.func @transform_9(%arg0: i32, %arg1: i32) -> (i32, i32, i32) {
    %c0_i32 = arith.constant 0 : i32
    %c0_i32_0 = arith.constant 0 : i32
    %c0_i32_1 = arith.constant 0 : i32
    return %arg0, %c0_i32, %c0_i32_0 : i32, i32, i32
  }
}

</mosaic_0001>

<bundles_post_ra>
// kernel: tpu_custom_call.1
= control target key start
LH: loop header
LB: loop body
LE: loop exit
PB: predicated region body
PF: predicated region fallthrough
CT: control target
= control target key end

     0   :  { %s2234_s0 = inlined_call_operand.vmem [shape: f32[4], index: 0, kind: input, shape index: {}]   ;;  %s2235_s1 = inlined_call_operand.vmem [shape: f32[2,8,32], index: 1, kind: input, shape index: {}]   ;;  %s2236_s2 = inlined_call_operand.vmem [shape: bf16[4,32,64], index: 2, kind: input, shape index: {}]   ;;  %s2237_s3 = inlined_call_operand.hbm [shape: f32[4,1,64], index: 3, kind: input, shape index: {}]   ;;  %s2238_s4 = inlined_call_operand.hbm [shape: bf16[4,32,32], index: 4, kind: input, shape index: {}]   ;;  %s2239_s5 = inlined_call_operand.vmem [shape: f32[6,32], index: 5, kind: input, shape index: {}]   ;;  %s2240_s6 = inlined_call_operand.hbm [shape: bf16[32,128], index: 6, kind: input, shape index: {}]   ;;  %s2241_s7 = inlined_call_operand.vmem [shape: f32[1,128], index: 7, kind: input, shape index: {}]   ;;  %s2242_s8 = inlined_call_operand.vmem [shape: bf16[128,32], index: 8, kind: input, shape index: {}]   ;;  %s2243_s9 = inlined_call_operand.hbm [shape: f32[2,8,32], index: 9, kind: output, shape index: {}]  }
   0x1   :  { %2260 = sst [smem:[#allocation25_spill]] %s2234_s0 }
   0x2   :  { %2261 = sst [smem:[#allocation26_spill]] %s2240_s6 }
   0x3   :  { %2262 = sst [smem:[#allocation27_spill]] %s2241_s7 }
   0x4   :  { %2263 = sst [smem:[#allocation28_spill]] %s2242_s8 }
   0x5   :  { %2264 = sst [smem:[#allocation29_spill]] %s2243_s9 }
   0x6   :  { %14 = vsyncpa [#allocation6], 0 }
   0x7   :  { %15 = vsyncpa [#allocation4], 0 }
   0x8   :  { %17 = vsyncpa [#allocation4 + $0x1], 0 }
   0x9   :  { %18 = vsyncpa [#allocation9], 0 }
   0xa   :  { %20 = vsyncpa [#allocation9 + $0x1], 0 }
   0xb   :  { %21 = vsyncpa [#allocation5], 0 }
   0xc   :  { %23 = vsyncpa [#allocation5 + $0x1], 0  ;;  %s1793_s30 = smov 0   ;;  %s1795_s10 = smov 0  }
   0xd   :  { %s1797_s11 = smov 0   ;;  %s1799_s12 = smov 0  }
   0xe   :  { %s1801_s13 = smov 0   ;;  %s1803_s14 = smov 0  }
   0xf   :  { %s1805_s15 = smov 0   ;;  %s1807_s16 = smov 0  }
  0x10   :  { %s1809_s17 = smov 0   ;;  %s1811_s18 = smov 0  }
  0x11   :  { %s1813_s19 = smov 0  }
  0x12 LB: > { %2265 = sst [smem:[#allocation17_spill]] %s1686_s30  ;;  %s1847_s20 = sadd.s32 4294967295, %s1726_s19   ;;  %s1726_s19 = sphi %s1813_s19, %s29_s19   ;;  %s1722_s18 = sphi %s1811_s18, %s2311_s18   ;;  %s1718_s17 = sphi %s1809_s17, %s2310_s17   ;;  %s1714_s16 = sphi %s1807_s16, %s2301_s16   ;;  %s1710_s15 = sphi %s1805_s15, %s2309_s15   ;;  %s1706_s14 = sphi %s1803_s14, %s2300_s14   ;;  %s1702_s13 = sphi %s1801_s13, %s2308_s13   ;;  %s1698_s12 = sphi %s1799_s12, %s2307_s12   ;;  %s1694_s11 = sphi %s1797_s11, %s2306_s11   ;;  %s1690_s10 = sphi %s1795_s10, %s2305_s10   ;;  %s1686_s30 = sphi %s1793_s30, %s2304_s30  }
  0x13   : > { %2266 = sst [smem:[#allocation18_spill]] %s1706_s14  ;;  %s1184_s21 = sadd.s32 4294967294, %s1726_s19  }
  0x14   : > { %2267 = sst [smem:[#allocation19_spill]] %s1722_s18  ;;  %p134_p0 = scmp.ne.s32.totalorder %s1702_s13, %s1698_s12 }
  0x15   : > { %p2250_p1 = scmp.eq.s32.totalorder %s1847_s20, 0  ;;  %p267_p2 = scmp.ne.s32.totalorder %s1694_s11, %s1690_s10 }
  0x16   : > { %p268_p4 = scmp.eq.s32.totalorder %s1847_s20, 7  ;;  %p273_p5 = scmp.ne.s32.totalorder %s1690_s10, %s1686_s30 }
  0x17   : > { %p1857_p3 = por %p2250_p1, %p134_p0  ;;  %p274_p6 = scmp.eq.s32.totalorder %s1184_s21, 7 }
  0x18   : > { %p1864_p7 = por %p268_p4, %p267_p2  ;;  %p1185_p8 = scmp.ge.s32.totalorder %s1726_s19, 1 }
  0x19   : > { %s2268_s23 = scalar_select %p1857_p3, 1, 0 }
  0x1a   : > { %s2269_s24 = scalar_select %p1864_p7, 1, 0 }
  0x1b   : > { %p1869_p9 = por %p274_p6, %p273_p5  ;;  %p281_p10 = scmp.lt.s32.totalorder %s1726_s19, 9 }
  0x1c   : > { %2270 = sst [smem:[#allocation20_spill]] %s2269_s24  ;;  %s1728_s27 = smov [#allocation10]  }
  0x1d   : > { %s2271_s25 = scalar_select %p1869_p9, 1, 0 }
  0x1e   : > { %p1874_p11 = pnand %p1185_p8, %p281_p10  ;;  %s307_s28 = sshll.u32 %s1728_s27, 4  ;;  %s308_s28 = int_to_ptr.vmem [resolvable:$true] %s307_s28 }
  0x1f   : > { %2272 = sst [smem:[#allocation21_spill]] %s2271_s25  ;;  %s2275_s0 = sld [smem:[#allocation25_spill]] }
  0x20   : > { %s2273_s26 = scalar_select %p1874_p11, 1, 0 }
  0x21   : > { %p1337_p12 = pneg %p1874_p11  ;;  %s2276_s6 = sld [smem:[#allocation26_spill]] }
  0x23   : > { %p1882_p13 = pnand %p1337_p12, %p2250_p1 }
  0x25   : > { %s294_s22 = sshll.u32 %s2275_s0, 4  ;;  %p1491_p2 = pneg %p1882_p13  ;;  %s295_s22 = int_to_ptr.vmem [resolvable:$true] %s294_s22 }
  0x27   : > { %s1489_s9 = scalar_lea.hbm %s2276_s6, 256 }
  0x28   : > { %p1490_p0 = scmp.ne.s32.totalorder %s2276_s6, %s1489_s9  ;;  %p1496_p6 = scmp.lt.u32.totalorder %s1489_s9, %s2276_s6 }
  0x2a   : > { %p1492_p4 = pnand %p1491_p2, %p1490_p0 }
  0x2c   : > { %p1493_p5 = pneg %p1492_p4 }
  0x2e   : > { %p1498_p8 = pnand %p1496_p6, %p1493_p5 }
  0x30   : > { %1501 = shalt.err (!%p1498_p8)
}
  0x31   : > { %s1502_s12 = scalar_lea.vmem %s308_s28, 256  ;;  %p1510_p9 = scmp.lt.s32.totalorder %s308_s28, %s308_s28 }
  0x32   : > { %p1503_p10 = scmp.ne.s32.totalorder %s308_s28, %s1502_s12  ;;  %p1511_p7 = scmp.lt.s32.totalorder %s1502_s12, %s1502_s12 }
  0x34   : > { %p1505_p12 = pnand %p1503_p10, %p1491_p2  ;;  %p1512_p3 = por %p1511_p7, %p1510_p9 }
  0x36   : > { %p1506_p1 = pneg %p1505_p12 }
  0x38   : > { %p1513_p11 = pnand %p1512_p3, %p1506_p1 }
  0x3a   : > { %1516 = shalt.err (!%p1513_p11)
}
  0x3b   : > { %s2254_s30 = smov 64   ;;  %s2255_s24 = smov 4  }
  0x3c   : > { %1343 = dma.hbm_to_vmem [thread:$0]  (!%p1882_p13), %s2276_s6, 256, %s308_s28, [#allocation9], %s2254_s30, %s2254_s30, %s2255_s24  }
  0x3d   : > { %s1517_s9 = scalar_lea.vmem %s295_s22, 16  ;;  %p1525_p3 = scmp.lt.s32.totalorder %s295_s22, %s295_s22 }
  0x3e   : > { %p1518_p0 = scmp.ne.s32.totalorder %s295_s22, %s1517_s9  ;;  %p1526_p9 = scmp.lt.s32.totalorder %s1517_s9, %s1517_s9 }
  0x40   : > { %p1520_p7 = pnand %p1518_p0, %p1491_p2  ;;  %p1527_p11 = por %p1526_p9, %p1525_p3 }
  0x42   : > { %p1521_p1 = pneg %p1520_p7 }
  0x44   : > { %p1528_p4 = pnand %p1527_p11, %p1521_p1 }
  0x46   : > { %1531 = shalt.err (!%p1528_p4)
}
  0x47   : > { %s1731_s25 = smov [#allocation3]   ;;  %s38_s28 = sadd.s32 1, %s1718_s17 }
  0x48   : > { %1340 = dma.vmem_to_smem (!%p1882_p13), %s295_s22, 16, %s1731_s25, [#allocation6]  }
  0x49   : > { %s41_s21 = sadd.s32 1, %s1722_s18  ;;  %p39_p2 = scmp.ge.s32.totalorder %s38_s28, 4 }
  0x4a   : > { %s121_s27 = sadd.s32 1, %s1706_s14  ;;  %p128_p5 = scmp.ne.s32.totalorder %s1706_s14, %s1702_s13 }
  0x4b   : > { %p129_p6 = scmp.eq.s32.totalorder %s1726_s19, 0  ;;  %s2313_s28 = smov (%p39_p2, %s38_s28), 0 }
  0x4c   : > { %2277 = sst [smem:[#allocation22_spill]] %s2313_s28  ;;  %s2315_s21 = smov (!%p39_p2, %s41_s21), %s1722_s18 }
  0x4d   : > { %s118_s29 = ssub.s32 %s1718_s17, %s2313_s28  ;;  %p1930_p8 = por %p129_p6, %p128_p5 }
  0x4e   : > { %p43_p13 = scmp.ge.s32.totalorder %s2315_s21, 2  ;;  %p119_p10 = scmp.eq.s32.totalorder %s118_s29, 0 }
  0x4f   : > { %p1357_p12 = scmp.lt.s32.totalorder %s1726_s19, 8  ;;  %s1936_s22 = sand.u32 1, %s1706_s14  }
  0x50   : > { %s2317_s21 = smov (%p43_p13, %s2315_s21), 0  ;;  %s1189_s9 = sshll.u32 %s1718_s17, 4 }
  0x51   : > { %2279 = sst [smem:[#allocation23_spill]] %s2317_s21  ;;  %s254_s8 = ssub.s32 %s1722_s18, %s2317_s21 }
  0x52   : > { %s1941_s7 = scalar_select %p119_p10, %s1706_s14, %s121_s27  }
  0x53   : > { %p255_p0 = scmp.eq.s32.totalorder %s254_s8, 0  ;;  %s345_s25 = scalar_lea.vmem [#allocation7], %s1936_s22 }
  0x54   : > { %2280 = sst [smem:[#allocation24_spill]] %s1941_s7  ;;  %s352_s30 = sshll.u32 %s345_s25, 4  ;;  %s1957_s30 = int_to_ptr.vmem [resolvable:$true] %s352_s30 }
  0x55   : > { %s2281_s24 = sadd.s32 1, %s1694_s11  ;;  %s1955_s28 = scalar_lea.hbm %s2237_s3, %s1189_s9 }
  0x56   : > { %s1950_s0 = scalar_select %p255_p0, %s1694_s11, %s2281_s24  }
  0x57   : > { %p1961_p7 = pnand %p1357_p12, %p1930_p8  ;;  %s1190_s24 = sshll.u32 %s1936_s22, 4 }
  0x58   : > { %s1235_s8 = sshll.u32 %s1718_s17, 8  ;;  %s1967_s25 = scalar_lea.vmem [#allocation8], %s1190_s24 }
  0x59   : > { %s370_s6 = sshll.u32 %s1967_s25, 4  ;;  %s343_s9 = scalar_lea.sflag [#allocation4], %s1936_s22  ;;  %s1998_s6 = int_to_ptr.vmem [resolvable:$true] %s370_s6 }
  0x5a   : > { %s1532_s29 = scalar_lea.hbm %s1955_s28, 16  ;;  %p1534_p3 = pneg %p1961_p7 }
  0x5b   : > { %p1533_p1 = scmp.ne.s32.totalorder %s1955_s28, %s1532_s29  ;;  %s1537_s18 = scalar_lea.hbm %s2237_s3, 64 }
  0x5c   : > { %p1538_p4 = scmp.lt.u32.totalorder %s1955_s28, %s2237_s3  ;;  %p1539_p2 = scmp.lt.u32.totalorder %s1537_s18, %s1532_s29 }
  0x5d   : > { %p1535_p9 = pnand %p1534_p3, %p1533_p1  ;;  %p1541_p6 = scmp.lt.u32.totalorder %s1532_s29, %s1955_s28 }
  0x5e   : > { %p1540_p5 = por %p1539_p2, %p1538_p4 }
  0x5f   : > { %p1536_p11 = pneg %p1535_p9 }
  0x60   : > { %p1542_p8 = por %p1541_p6, %p1540_p5 }
  0x62   : > { %p1543_p13 = pnand %p1542_p8, %p1536_p11 }
  0x64   : > { %1546 = shalt.err (!%p1543_p13)
}
  0x65   : > { %s1547_s22 = scalar_lea.vmem %s1957_s30, 16  ;;  %s1732_s21 = smov [#allocation7]  }
  0x66   : > { %p1548_p10 = scmp.ne.s32.totalorder %s1957_s30, %s1547_s22  ;;  %s1552_s24 = sshll.u32 %s1732_s21, 4  ;;  %s1553_s24 = int_to_ptr.vmem [resolvable:$false] %s1552_s24 }
  0x67   : > { %s1554_s14 = scalar_lea.vmem %s1553_s24, 32  ;;  %p1555_p1 = scmp.lt.s32.totalorder %s1957_s30, %s1553_s24 }
  0x68   : > { %p1550_p12 = pnand %p1548_p10, %p1534_p3  ;;  %p1556_p9 = scmp.lt.s32.totalorder %s1554_s14, %s1547_s22 }
  0x6a   : > { %p1551_p0 = pneg %p1550_p12  ;;  %p1557_p4 = por %p1556_p9, %p1555_p1 }
  0x6c   : > { %p1558_p2 = pnand %p1557_p4, %p1551_p0 }
  0x6e   : > { %1561 = shalt.err (!%p1558_p2)
}
  0x6f   : > { %1347 = dma.hbm_to_vmem [thread:$0]  (!%p1961_p7), %s1955_s28, 16, %s1957_s30, %s343_s9  }
  0x70   : > { %s359_s18 = sand.u32 1, %s1726_s19   ;;  %s2006_s12 = scalar_lea.hbm %s2238_s4, %s1235_s8 }
  0x71   : > { %s2008_s22 = scalar_lea.sflag [#allocation9], %s359_s18  ;;  %s1562_s21 = scalar_lea.hbm %s2006_s12, 256 }
  0x72   : > { %p1563_p11 = scmp.ne.s32.totalorder %s2006_s12, %s1562_s21  ;;  %s1567_s25 = scalar_lea.hbm %s2238_s4, 1024 }
  0x73   : > { %p1568_p8 = scmp.lt.u32.totalorder %s2006_s12, %s2238_s4  ;;  %p1569_p13 = scmp.lt.u32.totalorder %s1567_s25, %s1562_s21 }
  0x74   : > { %p1565_p5 = pnand %p1563_p11, %p1534_p3  ;;  %p1571_p12 = scmp.lt.u32.totalorder %s1562_s21, %s2006_s12 }
  0x75   : > { %p1570_p10 = por %p1569_p13, %p1568_p8 }
  0x76   : > { %p1566_p6 = pneg %p1565_p5 }
  0x77   : > { %p1572_p0 = por %p1571_p12, %p1570_p10 }
  0x79   : > { %p1573_p1 = pnand %p1572_p0, %p1566_p6 }
  0x7b   : > { %1576 = shalt.err (!%p1573_p1)
}
  0x7c   : > { %s1577_s8 = scalar_lea.vmem %s1998_s6, 256  ;;  %s1733_s14 = smov [#allocation8]  }
  0x7d   : > { %p1578_p9 = scmp.ne.s32.totalorder %s1998_s6, %s1577_s8  ;;  %s1582_s18 = sshll.u32 %s1733_s14, 4  ;;  %s1583_s18 = int_to_ptr.vmem [resolvable:$false] %s1582_s18 }
  0x7e   : > { %s1584_s7 = scalar_lea.vmem %s1583_s18, 512  ;;  %p1585_p11 = scmp.lt.s32.totalorder %s1998_s6, %s1583_s18 }
  0x7f   : > { %p1580_p4 = pnand %p1578_p9, %p1534_p3  ;;  %p1586_p5 = scmp.lt.s32.totalorder %s1584_s7, %s1577_s8 }
  0x81   : > { %p1581_p2 = pneg %p1580_p4  ;;  %p1587_p8 = por %p1586_p5, %p1585_p11 }
  0x83   : > { %p1588_p13 = pnand %p1587_p8, %p1581_p2 }
  0x85   : > { %1591 = shalt.err (!%p1588_p13)
}
  0x86   : > { %s2283_s29 = smov 4   ;;  %s2284_s21 = smov 64  }
  0x87   : > { %1350 = dma.hbm_to_vmem [thread:$0]  (!%p1961_p7), %s2006_s12, 256, %s1998_s6, %s2008_s22, %s2284_s21, %s2284_s21, %s2283_s29  }
  0x88   : > { %p2285_p3 = scmp.ne.s32.totalorder %s2273_s26, 0 }
  0x89   : > { %p2286_p6 = scmp.eq.s32.totalorder (!%p2285_p3), %s1847_s20, 0 }
  0x8a   : > { %382 = sbr.rel (%p2285_p3) target bundleno = 2599 (0xa27), region = 56 }
  0x91   : > { %1665 = dma.done.wait (%p2286_p6), [#allocation6], 16   ;;  %p2287_p10 = pmov %p2286_p6 }
  0x92   : > { %s2044_s30 = sand.u32 1, %s1702_s13   ;;  %p2288_p12 = scmp.ne.s32.totalorder %s2268_s23, 0 }
  0x93   : > { %1667 = vsyncadd (%p2287_p10), [#allocation6], 4294967280  ;;  %s389_s27 = scalar_lea.sflag [#allocation4], %s2044_s30  ;;  %s391_s28 = scalar_lea.vmem [#allocation7], %s2044_s30 }
  0x94   : > { %1669 = dma.done.wait (%p2288_p12), %s389_s27, 16  }
  0x95   : > { %1671 = vsyncadd (%p2288_p12), %s389_s27, 4294967280  ;;  %s396_s26 = sand.u32 1, %s1847_s20   ;;  %s1195_s6 = sshll.u32 %s2044_s30, 4 }
  0x96   : > { %s397_s12 = scalar_lea.sflag [#allocation9], %s396_s26  ;;  %s2054_s22 = scalar_lea.vmem [#allocation8], %s1195_s6 }
  0x97   : > { %1673 = dma.done.wait (%p2288_p12), %s397_s12, 256  }
  0x98   : > { %1675 = vsyncadd (%p2288_p12), %s397_s12, 4294967040  ;;  %p2289_p7 = pmov %p2286_p6 }
  0x99   : > { %p2290_p0 = pmov %p2286_p6 }
  0x9a   : > { %1677 = dma.done.wait (%p2289_p7), [#allocation9], 256  }
  0x9b   : > { %1679 = vsyncadd (%p2290_p0), [#allocation9], 4294967040 }
  0x9c   : > { %409 = sfence }
  0x9d   : > { %s450_s25 = sand.u32 1, %s1690_s10   ;;  %p453_p1 = scmp.lt.s32.totalorder %s1714_s16, 1 }
  0x9e   : > { %s2068_s9 = sshll.u32 %s450_s25, 3  ;;  %p457_p9 = scmp.lt.s32.totalorder %s1710_s15, 3 }
  0x9f   : > { %s454_s23 = scalar_select %p453_p1, %s1714_s16, 1 }
  0xa0   : > { %s458_s24 = scalar_select %p457_p9, %s1710_s15, 3 }
  0xa1   : > { %s1198_s8 = sshll.u32 %s454_s23, 3  ;;  %s452_s26 = scalar_lea.vmem [#allocation11], %s2068_s9 }
  0xa2   : > { %s456_s18 = scalar_lea.vmem %s2235_s1, %s1198_s8  ;;  %s1236_s7 = sshll.u32 %s458_s24, 4 }
  0xa3   : > { %s461_s27 = scalar_lea.vmem %s2236_s2, %s1236_s7  ;;  %p1201_p4 = scmp.ne.s32.totalorder %s1710_s15, 0 }
  0xa4   : > { %vm467_vm0 = vcmask (!%p1201_p4), 261120   ;;  %v1734_v0 = vmov (!%p1201_p4), 0.0  }
  0xa5   : > { %466 = sbr.rel (%p1201_p4) target bundleno = 172 (0xac), region = 76  ;;  %468 = vst.msk [vmem:[#allocation2] sm:$0xff] (!%p1201_p4), %vm467_vm0, %v1734_v0 }
  0xac PF: > { %v1461_v1 = vld [vmem:[%s461_s27] sm:$0xff]   ;;  %v1735_v2 = vmov 0.0   ;;  %v1462_v3 = vld [vmem:[%s461_s27 + $0x8] sm:$0xff]   ;;  %vm1736_vm1 = vmmov 0   ;;  %vm494_vm2 = vcmask 261120   ;;  %s1737_s6 = smov 112  }
  0xad   : > { %1261 = vmatprep.subr.bf16.mxu0 %v1735_v2  ;;  %1269 = vmatprep.subr.bf16.mxu1 %v1735_v2  ;;  %v2085_v4 = vld [vmem:[%s456_s18] sm:$0xff]  ;;  %s1738_s12 = smov 80   ;;  %s1739_s23 = smov 96   ;;  %vm542_vm3 = vcmask 130048   ;;  %vm639_vm4 = vcmask 64512   ;;  %vm670_vm5 = vcmask 1043456  }
  0xae   : > { %1262 = vmatpush3.bf16.msra.mxu0 %v1461_v1  ;;  %1265 = vmatprep.mubr.msk.bf16.mxu0 %vm1736_vm1, %v1735_v2  ;;  %v470_v5 = vpack.c.bf16 %v2085_v4, %v2085_v4  ;;  %v1202_v6 = vld [vmem:[%s391_s28] ss:$0 sm:$0xff]  ;;  %v1464_v40 = vld [vmem:[%s2054_s22 + $0x8] sm:$0xff]   ;;  %s662_s30 = sld [smem:[#allocation3 + %s1710_s15]]  ;;  %p1212_p2 = scmp.ne.s32.totalorder %s1710_s15, 3 }
  0xaf   : > { %1263 = vmatprep.subr.bf16.mxu0 %v1735_v2  ;;  %1271 = vmatprep.mubr.msk.bf16.mxu1 %vm1736_vm1, %v1735_v2  ;;  %v1463_v39 = vld [vmem:[%s2054_s22] sm:$0xff]   ;;  %vm1741_vm6 = vmmov (!%p1212_p2), 0   ;;  %s2291_s8 = sld [smem:[#allocation28_spill]] (!%p1212_p2)  ;;  %s2292_s21 = sld [smem:[#allocation27_spill]] (!%p1212_p2) }
  0xb0   : > { %v671_v38 = vsel %vm670_vm5, %v470_v5, 0  ;;  %v713_v56 = vld [vmem:[#allocation2] sm:$0xff] }
  0xb1   : > { %v1213_v63 = vld [vmem:[%s2239_s5] ss:$0 sm:$0xff] (!%p1212_p2) }
  0xb2   : > { %1264 = vmatpush3.bf16.msra.mxu0 %v1462_v3 }
  0xb3   : > { %1275 = vmatprep.subr.bf16.mxu0 %v1735_v2 }
  0xb4   : > { %v663_v45 = vstv %s662_s30 }
  0xb5   : > { %1266 = vmatmul.mubr.msk.bf16.vlgmr.msra.gmra.mrb[0].mxu0 %vm494_vm2, %v470_v5 }
  0xb6   : > { %1277 = vmatprep.mubr.msk.bf16.mxu0 %vm1736_vm1, %v1735_v2 }
 0x188   : > { %v532_v7 = vpop.f32.mrb[0].mxu0 }
 0x189   : > { %v533_v8 = vadd.f32 %v1202_v6, %v532_v7  ;;  %v1267_v9 = vpop.f32.mrb[1].mxu0 }
 0x18a   : > { %v535_v10 = vpop.f32.mrb[2].mxu0  ;;  %v1473_v9 = vld [vmem:[#allocation10] sm:$0xff] (!%p1212_p2)  }
 0x18b   : > { %v538_v11 = vpack.c.bf16 %v533_v8, %v533_v8  ;;  %v1268_v12 = vpop.f32.mrb[3].mxu0  ;;  %v1740_v10 = vmov (!%p1212_p2), 0.0  }
 0x18c   : > { %v1476_v12 = vld [vmem:[%s2291_s8 + $0x8] sm:$0xff] (!%p1212_p2)  }
 0x18d   : > { %589 = vrot.lane.b32.xlu1 %v538_v11, %s1737_s6  ;;  %591 = vrot.lane.b32.xlu0 %v538_v11, %s1738_s12 }
 0x191   : > { %540 = vrot.lane.b32.xlu0 %v538_v11, %s1739_s23 }
 0x1ff   : > { %v592_v13 = vpop.permute.xlu0 %591  ;;  %v590_v17 = vpop.permute.xlu1 %589 }
 0x200   : > { %v597_v14 = vsel %vm542_vm3, %v592_v13, 0  ;;  %v1477_v13 = vld [vmem:[%s2291_s8 + $0x10] sm:$0xff] (!%p1212_p2)  }
 0x201   : > { %1276 = vmatpush3.bf16.xpose.msra.mxu0 %v597_v14 }
 0x202   : > { %1287 = vmatprep.subr.bf16.mxu0 %v1735_v2 }
 0x203   : > { %v541_v15 = vpop.permute.xlu0 %540 }
 0x204   : > { %v547_v16 = vsel %vm542_vm3, %v541_v15, 0 }
 0x205   : > { %1270 = vmatpush3.bf16.xpose.msra.mxu1 %v547_v16 }
 0x206   : > { %1281 = vmatprep.subr.bf16.mxu1 %v1735_v2 }
 0x208   : > { %1278 = vmatmul.mubr.msk.bf16.vlgmr.msra.gmra.mrb[4].mxu0 %vm542_vm3, %v590_v17 }
 0x209   : > { %1291 = vmatprep.mubr.msk.bf16.mxu0 %vm1736_vm1, %v1735_v2  ;;  %1288 = vmatpush3.bf16.msra.mxu0 %v1463_v39 }
 0x20a   : > { %1289 = vmatprep.subr.bf16.mxu0 %v1735_v2 }
 0x20c   : > { %1272 = vmatmul.mubr.msk.bf16.vlgmr.msra.gmra.mrb[0].mxu1 %vm542_vm3, %v538_v11  ;;  %v1474_v11 = vld [vmem:[#allocation10 + $0x8] sm:$0xff] (!%p1212_p2)  }
 0x20d   : > { %1283 = vmatprep.mubr.msk.bf16.mxu1 %vm1736_vm1, %v1735_v2  ;;  %1282 = vmatpush3.bf16.msra.mxu1 %v671_v38 }
 0x20e   : > { %1290 = vmatpush3.bf16.msra.mxu0 %v1464_v40  ;;  %1303 = vmatprep.subr.bf16.mxu1 (!%p1212_p2), %v1740_v10 }
 0x20f   : > { %1295 = vmatprep.subr.bf16.mxu0 (!%p1212_p2), %v1740_v10 }
 0x2db   : > { %v633_v18 = vpop.f32.mrb[4].mxu0 }
 0x2dc   : > { %v1279_v19 = vpop.f32.mrb[5].mxu0  ;;  %v651_v20 = vsel %vm639_vm4, %v633_v18, -inf }
 0x2dd   : > { %652 = vmax.xlane.f32.xlu1 %v651_v20  ;;  %v636_v21 = vpop.f32.mrb[6].mxu0  ;;  %v1215_v20 = vld [vmem:[%s2239_s5 + $0x2] ss:$0 sm:$0xff] (!%p1212_p2) }
 0x2de   : > { %v1280_v22 = vpop.f32.mrb[7].mxu0 }
 0x2df   : > { %v583_v23 = vpop.f32.mrb[0].mxu1 }
 0x2e0   : > { %v1273_v24 = vpop.f32.mrb[1].mxu1  ;;  %v640_v25 = vsel %vm639_vm4, %v583_v23, -inf }
 0x2e1   : > { %641 = vmax.xlane.f32.xlu0 %v640_v25  ;;  %v586_v26 = vpop.f32.mrb[2].mxu1  ;;  %v1478_v24 = vld [vmem:[%s2291_s8 + $0x18] sm:$0xff] (!%p1212_p2)   ;;  %v1479_v25 = vld [vmem:[%s2291_s8 + $0x20] sm:$0xff] (!%p1212_p2)  }
 0x2e2   : > { %v1274_v27 = vpop.f32.mrb[3].mxu1  ;;  %v1480_v26 = vld [vmem:[%s2291_s8 + $0x28] sm:$0xff] (!%p1212_p2)  }
 0x2e3   : > { %v1481_v27 = vld [vmem:[%s2291_s8 + $0x30] sm:$0xff] (!%p1212_p2)  }
 0x36a   : > { %v653_v28 = vpop.xlane.xlu1 %652 }
 0x36b   : > { %v654_v29 = vsub.f32 %v633_v18, %v653_v28  ;;  %v1214_v18 = vld [vmem:[%s2239_s5 + $0x1] ss:$0 sm:$0xff] (!%p1212_p2)  ;;  %v1482_v28 = vld [vmem:[%s2291_s8 + $0x38] sm:$0xff] (!%p1212_p2)  }
 0x36d   : > { %v655_v30 = vmul.f32 1.442695, %v654_v29  ;;  %v1216_v29 = vld [vmem:[%s2292_s21] ss:$0 sm:$0xff] (!%p1212_p2) }
 0x36e   : > { %v642_v31 = vpop.xlane.xlu0 %641 }
 0x36f   : > { %1465 = vpow2.f32 %v655_v30  ;;  %v643_v32 = vsub.f32 %v583_v23, %v642_v31 }
 0x371   : > { %v644_v33 = vmul.f32 1.442695, %v643_v32 }
 0x373   : > { %1467 = vpow2.f32 %v644_v33 }
 0x379   : > { %v1466_v34 = vpop.eup %1465 }
 0x37a   : > { %v657_v35 = vsel %vm639_vm4, %v1466_v34, 0.0 }
 0x37b   : > { %658 = vadd.xlane.f32.xlu0 %v657_v35 }
 0x37d   : > { %v1468_v36 = vpop.eup %1467 }
 0x37e   : > { %v646_v37 = vsel %vm639_vm4, %v1468_v36, 0.0 }
 0x37f   : > { %647 = vadd.xlane.f32.xlu1 %v646_v37 }
 0x408   : > { %v659_v41 = vpop.xlane.xlu0 %658 }
 0x409   : > { %1469 = vrcp.f32 %v659_v41  ;;  %v1220_v41 = vld [vmem:[%s2239_s5 + $0x3] ss:$0 sm:$0xff] (!%p1212_p2) }
 0x40c   : > { %v648_v42 = vpop.xlane.xlu1 %647 }
 0x40d   : > { %1471 = vrcp.f32 %v648_v42 }
 0x413   : > { %v1470_v43 = vpop.eup %1469 }
 0x414   : > { %v661_v44 = vmul.f32 %v1470_v43, %v1466_v34 }
 0x416   : > { %v664_v47 = vmul.f32 %v663_v45, %v661_v44 }
 0x417   : > { %v1472_v46 = vpop.eup %1471 }
 0x418   : > { %v650_v48 = vmul.f32 %v1472_v46, %v1468_v36 }
 0x41a   : > { %v665_v49 = vsub.f32 %v650_v48, %v664_v47 }
 0x41c   : > { %v666_v50 = vpack.c.bf16 %v665_v49, %v665_v49 }
 0x41e   : > { %1284 = vmatmul.mubr.msk.bf16.vlgmr.msra.gmra.mrb[4].mxu1 %vm639_vm4, %v666_v50 }
 0x41f   : > { %1319 = vmatprep.mubr.msk.bf16.mxu1 (!%p1212_p2), %vm1741_vm6, %v1740_v10 }
 0x4f1   : > { %v707_v51 = vpop.f32.mrb[4].mxu1 }
 0x4f2   : > { %v714_v52 = vpack.c.bf16 %v707_v51, %v707_v51  ;;  %v1285_v53 = vpop.f32.mrb[5].mxu1 }
 0x4f3   : > { %v710_v54 = vpop.f32.mrb[6].mxu1 }
 0x4f4   : > { %v1286_v55 = vpop.f32.mrb[7].mxu1  ;;  %1292 = vmatmul.mubr.msk.bf16.vlgmr.msra.gmra.mrb[8].mxu0 %vm494_vm2, %v714_v52 }
 0x4f5   : > { %1299 = vmatprep.mubr.msk.bf16.mxu0 (!%p1212_p2), %vm1741_vm6, %v1740_v10  ;;  %1296 = vmatpush3.bf16.msra.mxu0 (!%p1212_p2), %v1473_v9 }
 0x4f6   : > { %1297 = vmatprep.subr.bf16.mxu0 (!%p1212_p2), %v1740_v10 }
 0x4f9   : > { %1298 = vmatpush3.bf16.msra.mxu0 (!%p1212_p2), %v1474_v11 }
 0x5c4   : > { %779 = sbr.rel (%p1212_p2) target bundleno = 2572 (0xa0c), region = 80 }
 0x5c7   : > { %v768_v57 = vpop.f32.mrb[8].mxu0 }
 0x5c8   : > { %v774_v58 = vadd.f32 %v768_v57, %v713_v56  ;;  %v1293_v59 = vpop.f32.mrb[9].mxu0 }
 0x5c9   : > { %v771_v60 = vpop.f32.mrb[10].mxu0 }
 0x5ca   : > { %775 = vst.msk [vmem:[#allocation2] sm:$0xff] %vm494_vm2, %v774_v58  ;;  %v1294_v61 = vpop.f32.mrb[11].mxu0  ;;  %v1229_v58 = vld [vmem:[%s2239_s5 + $0x4] ss:$0 sm:$0xff] (!%p1212_p2)  ;;  %v1230_v60 = vld [vmem:[%s2239_s5 + $0x5] ss:$0 sm:$0xff] (!%p1212_p2) }
 0x5d1   : > { %v780_v62 = vld [vmem:[#allocation2] sm:$0xff] }
 0x5d2   : > { %v786_v0 = vadd.f32 %v1213_v63, %v780_v62 }
 0x5d4   : > { %v787_v1 = vadd.f32 %v786_v0, %v2085_v4  ;;  %v1475_v4 = vld [vmem:[%s2291_s8] sm:$0xff]  }
 0x5d5   : > { %1304 = vmatpush3.bf16.msra.mxu1 %v1475_v4 }
 0x5d6   : > { %v790_v2 = vsel %vm494_vm2, %v787_v1, 0.0  ;;  %1305 = vmatprep.subr.bf16.mxu1 %v1740_v10 }
 0x5d7   : > { %791 = vadd.xlane.f32.xlu0 %v790_v2 }
 0x5d9   : > { %1306 = vmatpush3.bf16.msra.mxu1 %v1476_v12 }
 0x5da   : > { %1307 = vmatprep.subr.bf16.mxu1 %v1740_v10 }
 0x5dd   : > { %1308 = vmatpush3.bf16.msra.mxu1 %v1477_v13 }
 0x5de   : > { %1309 = vmatprep.subr.bf16.mxu1 %v1740_v10 }
 0x5e1   : > { %1310 = vmatpush3.bf16.msra.mxu1 %v1478_v24 }
 0x5e2   : > { %1311 = vmatprep.subr.bf16.mxu1 %v1740_v10 }
 0x5e5   : > { %1312 = vmatpush3.bf16.msra.mxu1 %v1479_v25 }
 0x5e6   : > { %1313 = vmatprep.subr.bf16.mxu1 %v1740_v10 }
 0x5e9   : > { %1314 = vmatpush3.bf16.msra.mxu1 %v1480_v26 }
 0x5ea   : > { %1315 = vmatprep.subr.bf16.mxu1 %v1740_v10 }
 0x5ed   : > { %1316 = vmatpush3.bf16.msra.mxu1 %v1481_v27 }
 0x5ee   : > { %1317 = vmatprep.subr.bf16.mxu1 %v1740_v10 }
 0x5f1   : > { %1318 = vmatpush3.bf16.msra.mxu1 %v1482_v28 }
 0x664   : > { %v792_v3 = vpop.xlane.xlu0 %791 }
 0x665   : > { %v794_v5 = vmul.f32 0.03125, %v792_v3 }
 0x667   : > { %v795_v6 = vsub.f32 %v787_v1, %v794_v5 }
 0x669   : > { %v796_v7 = vmul.f32 %v795_v6, %v795_v6 }
 0x66b   : > { %v797_v8 = vsel %vm494_vm2, %v796_v7, 0.0 }
 0x66c   : > { %798 = vadd.xlane.f32.xlu0 %v797_v8 }
 0x6f9   : > { %v799_v14 = vpop.xlane.xlu0 %798 }
 0x6fa   : > { %v800_v15 = vmul.f32 0.03125, %v799_v14 }
 0x6fc   : > { %v801_v16 = vadd.f32 1e-05, %v800_v15 }
 0x6fe   : > { %1483 = vrsqrt.f32 %v801_v16 }
 0x708   : > { %v1484_v17 = vpop.eup %1483 }
 0x709   : > { %v803_v19 = vmul.f32 %v1484_v17, %v795_v6 }
 0x70b   : > { %v808_v21 = vmul.f32 %v1214_v18, %v803_v19 }
 0x70d   : > { %v813_v22 = vadd.f32 %v1215_v20, %v808_v21 }
 0x70f   : > { %v814_v23 = vpack.c.bf16 %v813_v22, %v813_v22 }
 0x711   : > { %1300 = vmatmul.mubr.msk.bf16.vlgmr.msra.gmra.mrb[0].mxu0 %vm494_vm2, %v814_v23 }
 0x7e4   : > { %v875_v30 = vpop.f32.mrb[0].mxu0 }
 0x7e5   : > { %v876_v31 = vadd.f32 %v1216_v29, %v875_v30  ;;  %v1301_v32 = vpop.f32.mrb[1].mxu0 }
 0x7e6   : > { %v878_v33 = vpop.f32.mrb[2].mxu0 }
 0x7e7   : > { %v882_v34 = vmul.f32 0.70710677, %v876_v31  ;;  %v1302_v35 = vpop.f32.mrb[3].mxu0  ;;  %v881_v37 = vmul.f32 0.5, %v876_v31 }
 0x7e9   : > { %1485 = verf.f32 %v882_v34 }
 0x7f3   : > { %v1486_v36 = vpop.eup %1485 }
 0x7f4   : > { %v884_v38 = vadd.f32 1.0, %v1486_v36 }
 0x7f6   : > { %v885_v39 = vmul.f32 %v884_v38, %v881_v37 }
 0x7f8   : > { %v886_v40 = vpack.c.bf16 %v885_v39, %v885_v39 }
 0x7fa   : > { %1320 = vmatmul.mubr.bf16.vlgmr.msra.gmra.mrb[0].mxu1 %v886_v40 }
 0x8cd   : > { %v990_v42 = vpop.f32.mrb[0].mxu1 }
 0x8ce   : > { %v991_v43 = vadd.f32 %v1220_v41, %v990_v42  ;;  %v1321_v44 = vpop.f32.mrb[1].mxu1 }
 0x8cf   : > { %v993_v45 = vpop.f32.mrb[2].mxu1 }
 0x8d0   : > { %v1322_v46 = vpop.f32.mrb[3].mxu1  ;;  %v996_v47 = vadd.f32 %v991_v43, %v813_v22 }
 0x8d2   : > { %v999_v48 = vsel %vm494_vm2, %v996_v47, 0.0 }
 0x8d3   : > { %1000 = vadd.xlane.f32.xlu1 %v999_v48 }
 0x960   : > { %v1001_v49 = vpop.xlane.xlu1 %1000 }
 0x961   : > { %v1002_v50 = vmul.f32 0.03125, %v1001_v49 }
 0x963   : > { %v1003_v51 = vsub.f32 %v996_v47, %v1002_v50 }
 0x965   : > { %v1004_v52 = vmul.f32 %v1003_v51, %v1003_v51 }
 0x967   : > { %v1005_v53 = vsel %vm494_vm2, %v1004_v52, 0.0 }
 0x968   : > { %1006 = vadd.xlane.f32.xlu1 %v1005_v53 }
 0x9f5   : > { %v1007_v54 = vpop.xlane.xlu1 %1006 }
 0x9f6   : > { %v1008_v55 = vmul.f32 0.03125, %v1007_v54 }
 0x9f8   : > { %v1009_v56 = vadd.f32 1e-05, %v1008_v55 }
 0x9fa   : > { %1487 = vrsqrt.f32 %v1009_v56 }
 0xa04   : > { %v1488_v57 = vpop.eup %1487 }
 0xa05   : > { %v1011_v59 = vmul.f32 %v1488_v57, %v1003_v51 }
 0xa07   : > { %v1016_v61 = vmul.f32 %v1229_v58, %v1011_v59 }
 0xa09   : > { %v1021_v62 = vadd.f32 %v1230_v60, %v1016_v61 }
 0xa0b   : > { %1022 = vst.msk [vmem:[%s452_s26] sm:$0xff] %vm494_vm2, %v1021_v62 }
 0xa0c PF: > { %s2293_s22 = sld [smem:[#allocation20_spill]]  ;;  %s1232_s15 = sshll.u32 %s1714_s16, 7 }
 0xa0d   : > { %s2294_s20 = sld [smem:[#allocation29_spill]]  ;;  %s1037_s7 = sshll.u32 %s452_s26, 4  ;;  %s1038_s7 = int_to_ptr.vmem [resolvable:$true] %s1037_s7 }
 0xa0e   : > { %s1024_s29 = scalar_lea.sflag [#allocation5], %s450_s25  ;;  %s1592_s21 = scalar_lea.vmem %s1038_s7, 128 }
 0xa0f   : > { %p1593_p11 = scmp.ne.s32.totalorder %s1038_s7, %s1592_s21  ;;  %s1742_s27 = smov [#allocation11]  }
 0xa10   : > { %s1596_s6 = sshll.u32 %s1742_s27, 4  ;;  %s1597_s6 = int_to_ptr.vmem [resolvable:$false] %s1596_s6 }
 0xa11   : > { %s1598_s12 = scalar_lea.vmem %s1597_s6, 256  ;;  %p1599_p3 = scmp.lt.s32.totalorder %s1038_s7, %s1597_s6 }
 0xa12   : > { %p2295_p5 = scmp.ne.s32.totalorder %s2293_s22, 0  ;;  %p1600_p6 = scmp.lt.s32.totalorder %s1598_s12, %s1592_s21 }
 0xa13   : > { %s2174_s18 = scalar_lea.hbm %s2294_s20, %s1232_s15 }
 0xa14   : > { %p1594_p8 = pnand %p1593_p11, %p2295_p5  ;;  %p1601_p10 = por %p1600_p6, %p1599_p3 }
 0xa16   : > { %p1595_p13 = pneg %p1594_p8 }
 0xa18   : > { %p1602_p12 = pnand %p1601_p10, %p1595_p13 }
 0xa1a   : > { %1605 = shalt.err (!%p1602_p12)
}
 0xa1b   : > { %s1606_s16 = scalar_lea.hbm %s2174_s18, 128  ;;  %s1610_s26 = scalar_lea.hbm %s2294_s20, 256 }
 0xa1c   : > { %p1607_p7 = scmp.ne.s32.totalorder %s2174_s18, %s1606_s16  ;;  %p1611_p9 = scmp.lt.u32.totalorder %s2174_s18, %s2294_s20 }
 0xa1d   : > { %p1612_p4 = scmp.lt.u32.totalorder %s1610_s26, %s1606_s16  ;;  %p1614_p11 = scmp.lt.u32.totalorder %s1606_s16, %s2174_s18 }
 0xa1e   : > { %p1608_p0 = pnand %p1607_p7, %p2295_p5 }
 0xa1f   : > { %p1613_p2 = por %p1612_p4, %p1611_p9 }
 0xa20   : > { %p1609_p1 = pneg %p1608_p0 }
 0xa21   : > { %p1615_p8 = por %p1614_p11, %p1613_p2 }
 0xa23   : > { %p1616_p13 = pnand %p1615_p8, %p1609_p1 }
 0xa25   : > { %1619 = shalt.err (!%p1616_p13)
}
 0xa26   : > { %1335 = dma.vmem_to_hbm [thread:$0]  (%p2295_p5), %s1038_s7, 128, %s2174_s18, %s1024_s29  }
 0xa27 PF: > { %s2296_s28 = sld [smem:[#allocation17_spill]]  ;;  %s2297_s15 = sld [smem:[#allocation21_spill]] }
 0xa28   : > { %p1360_p3 = scmp.ge.s32.totalorder %s1726_s19, 2 }
 0xa2d   : > { %s1049_s24 = sand.u32 1, %s2296_s28   ;;  %p2298_p6 = scmp.ne.s32.totalorder %s2297_s15, 0 }
 0xa2e   : > { %s1050_s14 = scalar_lea.sflag [#allocation5], %s1049_s24 }
 0xa2f   : > { %p1352_p10 = pnand %p1360_p3, %p2298_p6 }
 0xa31   : > { %1681 = dma.done.wait (!%p1352_p10), %s1050_s14, 128  }
 0xa32   : > { %1683 = vsyncadd (!%p1352_p10), %s1050_s14, 4294967168  ;;  %s29_s19 = sadd.s32 1, %s1726_s19   ;;  %s2299_s22 = sld [smem:[#allocation18_spill]] }
 0xa33   : > { %p26_p12 = scmp.ge.s32.totalorder %s29_s19, 10   ;;  %s2300_s14 = sld [smem:[#allocation24_spill]] }
 0xa34   : > { %s2301_s16 = sld [smem:[#allocation19_spill]]  ;;  %s2302_s18 = sld [smem:[#allocation22_spill]] }
 0xa35   : > { %s2303_s7 = sld [smem:[#allocation23_spill]]  ;;  %s2304_s30 = smov %s1690_s10 }
 0xa36   : > { %s2305_s10 = smov %s1694_s11  ;;  %s2306_s11 = smov %s1950_s0 }
 0xa37   : > { %s2307_s12 = smov %s1702_s13  ;;  %s2309_s15 = smov %s1718_s17 }
 0xa38   : > { %s2308_s13 = smov %s2299_s22  ;;  %28 = sbr.rel (!%p26_p12) target bundleno = 18 (0x12), region = 137 }
 0xa3a   : > { %s2310_s17 = smov %s2302_s18 }
 0xa3b   : > { %s2311_s18 = smov %s2303_s7 }
 0xa3f   :  { %1055 = vsyncpa [#allocation4], 1 }
 0xa40   :  { %1057 = vsyncpa [#allocation4 + $0x1], 1 }
 0xa41   :  { %1058 = vsyncpa [#allocation9], 1 }
 0xa42   :  { %1060 = vsyncpa [#allocation9 + $0x1], 1 }
 0xa43   :  { %1061 = vsyncpa [#allocation5], 1 }
 0xa44   :  { %1063 = vsyncpa [#allocation5 + $0x1], 1 }
 0xa45   :  { %1064 = vsyncpa [#allocation6], 1 }
 0xa46   :  { %1066 = vsyncpa [#allocation6 + $0x1], 1 }

</bundles_post_ra>
